<compile_context>
chip_gen: v7x
topology: tpu7x:2x2x1
jax: 0.10.0
libtpu: 0.0.40
codegen_flags: <defaults>
</compile_context>

<pallas_src>
import functools

import jax
import jax.numpy as jnp
from jax.experimental import pallas as pl
from jax.experimental.pallas import tpu as pltpu


B_PAD = 8  # one f32 sublane tile


def _round_up(n, m):
    return ((n + m - 1) // m) * m


# ----------------------------- Pallas kernel -------------------------------

def _lstm_kernel(buf_ref, y_ref, *,
                 T, D, H, O,
                 off_x, off_wih0, off_whh0, off_w1, off_b, off_wlin, off_blin):
    H4 = 4 * H
    B = B_PAD

    # One packed VMEM operand; parameter views are free static slices.
    xflat = buf_ref[off_x:off_x + T * B, 0:D]            # (T*B, D)
    wih0  = buf_ref[off_wih0:off_wih0 + D, 0:H4]         # (D, 4H)
    whh0  = buf_ref[off_whh0:off_whh0 + H, 0:H4]         # (H, 4H)
    w1    = buf_ref[off_w1:off_w1 + 2 * H, 0:H4]         # (2H, 4H)  [wih1; whh1]
    b0    = buf_ref[off_b:off_b + 1, 0:H4]               # (1, 4H)
    b1    = buf_ref[off_b + 1:off_b + 2, 0:H4]           # (1, 4H)
    wlin  = buf_ref[off_wlin:off_wlin + H, 0:O]          # (H, O)
    blin  = buf_ref[off_blin:off_blin + 1, 0:O]          # (1, O)

    # Hoisted layer-0 input projection for ALL timesteps: one MXU matmul,
    # no sequential dependence, so it is off the recurrent critical path.
    xz0 = jnp.dot(xflat, wih0, preferred_element_type=jnp.float32) + b0   # (T*B, 4H)

    # Hoist the b1 broadcast out of the unrolled loop (no CSE of broadcasts).
    b1b = jnp.broadcast_to(b1, (B, H4))

    def gates(z):
        # 2 whole-vreg EUP passes (sigmoid + tanh over (B, 4H)) instead of 4
        # per-gate ones; i/f/o from the sigmoid pass, g from the tanh pass.
        s = jax.nn.sigmoid(z)
        th = jnp.tanh(z)
        return (s[:, 0 * H:1 * H],      # i
                s[:, 1 * H:2 * H],      # f
                th[:, 2 * H:3 * H],     # g
                s[:, 3 * H:4 * H])      # o

    h0 = jnp.zeros((B, H), jnp.float32)
    c0 = jnp.zeros((B, H), jnp.float32)
    h1 = jnp.zeros((B, H), jnp.float32)
    c1 = jnp.zeros((B, H), jnp.float32)

    # T is a static trace-time constant -> fully-unrolled recurrence with
    # sublane-tile-aligned (8-row) slices of xz0.
    # TODO(synk): for T in the hundreds, switch to lax.fori_loop(..., unroll=k)
    # to bound code size; also re-check VMEM footprint vs vmem_limit_bytes.
    for t in range(T):
        # ---- layer 0 (input projection already hoisted) ----
        z0 = xz0[t * B:(t + 1) * B, :] + jnp.dot(
            h0, whh0, preferred_element_type=jnp.float32)
        i0, f0, g0, o0 = gates(z0)
        c0 = f0 * c0 + i0 * g0
        h0 = o0 * jnp.tanh(c0)

        # ---- layer 1: single fused matmul concat([h0,h1]) @ [wih1; whh1] ----
        h01 = jnp.concatenate([h0, h1], axis=1)          # (B, 2H) lane concat
        z1 = jnp.dot(h01, w1, preferred_element_type=jnp.float32) + b1b
        i1, f1, g1, o1 = gates(z1)
        c1 = f1 * c1 + i1 * g1
        h1 = o1 * jnp.tanh(c1)

    # Linear head on the final timestep's top-layer hidden state.
    y_ref[...] = jnp.dot(h1, wlin, preferred_element_type=jnp.float32) + blin


# ------------------------------ wrapper -------------------------------------

@jax.jit
def lstm_forward(x, params):
    """x: (T, B, D) float32 (seq-major).  Returns (B, output_dim) float32."""
    T, B, D = x.shape
    H = params["whh0"].shape[0]
    H4 = 4 * H
    O = params["wlin"].shape[-1]
    assert B <= B_PAD

    C = max(H4, D, O)  # packed-buffer lane width

    # 8-row-aligned regions inside the single packed operand.
    off_x    = 0
    off_wih0 = off_x + _round_up(T * B_PAD, 8)
    off_whh0 = off_wih0 + _round_up(D, 8)
    off_w1   = off_whh0 + _round_up(H, 8)
    off_b    = off_w1 + _round_up(2 * H, 8)
    off_wlin = off_b + 8
    off_blin = off_wlin + _round_up(H, 8)
    n_rows   = off_blin + 8

    # Pack x (batch zero-padded to one sublane tile) + all parameters into ONE
    # buffer -> one kernel-entry DMA instead of ten tiny ones.  ~12 KB total,
    # far under the scoped VMEM limit on every generation (v5e/v6e/v7x).
    x_pad = jnp.zeros((T, B_PAD, D), jnp.float32).at[:, :B, :].set(x)
    buf = jnp.zeros((n_rows, C), jnp.float32)
    buf = buf.at[off_x:off_x + T * B_PAD, 0:D].set(x_pad.reshape(T * B_PAD, D))
    buf = buf.at[off_wih0:off_wih0 + D, 0:H4].set(params["wih0"])
    buf = buf.at[off_whh0:off_whh0 + H, 0:H4].set(params["whh0"])
    buf = buf.at[off_w1:off_w1 + 2 * H, 0:H4].set(
        jnp.concatenate([params["wih1"], params["whh1"]], axis=0))
    buf = buf.at[off_b, 0:H4].set(params["b0"][0])
    buf = buf.at[off_b + 1, 0:H4].set(params["b1"][0])
    buf = buf.at[off_wlin:off_wlin + H, 0:O].set(params["wlin"])
    buf = buf.at[off_blin, 0:O].set(params["blin"][0])

    kernel = functools.partial(
        _lstm_kernel, T=T, D=D, H=H, O=O,
        off_x=off_x, off_wih0=off_wih0, off_whh0=off_whh0, off_w1=off_w1,
        off_b=off_b, off_wlin=off_wlin, off_blin=off_blin)

    # No grid: the whole problem lives in VMEM for a single invocation.
    # (Recurrence is serial in time; at B=2 a per-core batch split on v7x is
    # not worth it — add a "parallel" batch grid axis only if batch grows.)
    y_pad = pl.pallas_call(
        kernel,
        out_shape=jax.ShapeDtypeStruct((B_PAD, O), jnp.float32),
        in_specs=[pl.BlockSpec(memory_space=pltpu.MemorySpace.VMEM)],
        out_specs=pl.BlockSpec(memory_space=pltpu.MemorySpace.VMEM),
    )(buf)
    return y_pad[:B, :]


# --------------------------- pure-JAX reference ------------------------------

def lstm_ref(x, p):
    T, B, _ = x.shape
    H = p["whh0"].shape[0]

    def gates(z):
        return (jax.nn.sigmoid(z[:, 0 * H:1 * H]),
                jax.nn.sigmoid(z[:, 1 * H:2 * H]),
                jnp.tanh(z[:, 2 * H:3 * H]),
                jax.nn.sigmoid(z[:, 3 * H:4 * H]))

    h0 = jnp.zeros((B, H), jnp.float32)
    c0 = jnp.zeros((B, H), jnp.float32)
    h1 = jnp.zeros((B, H), jnp.float32)
    c1 = jnp.zeros((B, H), jnp.float32)

    for t in range(T):
        z0 = x[t] @ p["wih0"] + h0 @ p["whh0"] + p["b0"]
        i, f, g, o = gates(z0)
        c0 = f * c0 + i * g
        h0 = o * jnp.tanh(c0)

        z1 = h0 @ p["wih1"] + h1 @ p["whh1"] + p["b1"]
        i, f, g, o = gates(z1)
        c1 = f * c1 + i * g
        h1 = o * jnp.tanh(c1)

    return h1 @ p["wlin"] + p["blin"]


# ------------------------------- params --------------------------------------

def init_params(key, input_dim, hidden_dim, output_dim):
    """Deterministic init mimicking PyTorch's U(-1/sqrt(H), 1/sqrt(H)).

    LSTM weights are stored gate-fused: wih* : (in, 4H), whh* : (H, 4H) with
    the i|f|g|o gates concatenated along the last (lane) axis, matching the
    transpose of PyTorch's (4H, in) stacking.  Biases are stored already
    combined (b_ih + b_hh) as (1, 4H).
    """
    k = 1.0 / jnp.sqrt(hidden_dim)
    keys = jax.random.split(key, 10)
    H4 = 4 * hidden_dim

    def u(kk, shape):
        return jax.random.uniform(kk, shape, jnp.float32, -k, k)

    return {
        "wih0": u(keys[0], (input_dim, H4)),
        "whh0": u(keys[1], (hidden_dim, H4)),
        "b0":   u(keys[2], (1, H4)) + u(keys[3], (1, H4)),
        "wih1": u(keys[4], (hidden_dim, H4)),
        "whh1": u(keys[5], (hidden_dim, H4)),
        "b1":   u(keys[6], (1, H4)) + u(keys[7], (1, H4)),
        "wlin": u(keys[8], (hidden_dim, output_dim)),
        "blin": u(keys[9], (1, output_dim)),
    }


# --------------------------------- main ---------------------------------------

if __name__ == "__main__":
    # Module constants: hidden_dim=6, num_layers=2, output_dim=3
    input_dim = 4
    hidden_dim = 6
    output_dim = 3
    batch_size = 2
    seq_len = 8

    root = jax.random.PRNGKey(0)
    k_x, k_p = jax.random.split(root)

    x = jax.random.normal(k_x, (seq_len, batch_size, input_dim), jnp.float32)
    params = init_params(k_p, input_dim, hidden_dim, output_dim)

    # TODO(synk): the module also caches self.hidden (h_n, c_n); only the
    # forward's y_pred output is produced here.
    y = lstm_forward(x, params)
    jax.block_until_ready(y)

    y_ref = lstm_ref(x, params)
    assert y.shape == (batch_size, output_dim)
    # Tolerance accounts for MXU default-precision f32 matmuls (bf16 passes)
    # differing slightly between the Pallas kernel and the XLA reference.
    assert jnp.allclose(y, y_ref, atol=1e-3, rtol=1e-3), (y, y_ref)

    print("KERNEL_OK")
</pallas_src>

<mosaic_0001>
module attributes {stable_mosaic.version = 11 : i64} {
  func.func @_lstm_kernel(%arg0: memref<120x24xf32, #tpu.memory_space<vmem>>, %arg1: memref<8x3xf32, #tpu.memory_space<vmem>>) attributes {dimension_semantics = [], scalar_prefetch = 0 : i64, scratch_operands = 0 : i64, tpu.core_type = #tpu.core_type<tc>} {
    %c0 = arith.constant 0 : index
    %c0_0 = arith.constant 0 : index
    %0 = vector.load %arg0[%c0, %c0_0] : memref<120x24xf32, #tpu.memory_space<vmem>>, vector<64x4xf32>
    %c64 = arith.constant 64 : index
    %c0_1 = arith.constant 0 : index
    %1 = vector.load %arg0[%c64, %c0_1] : memref<120x24xf32, #tpu.memory_space<vmem>>, vector<4x24xf32>
    %c72 = arith.constant 72 : index
    %c0_2 = arith.constant 0 : index
    %2 = vector.load %arg0[%c72, %c0_2] : memref<120x24xf32, #tpu.memory_space<vmem>>, vector<6x24xf32>
    %c80 = arith.constant 80 : index
    %c0_3 = arith.constant 0 : index
    %3 = vector.load %arg0[%c80, %c0_3] : memref<120x24xf32, #tpu.memory_space<vmem>>, vector<12x24xf32>
    %c96 = arith.constant 96 : index
    %c0_4 = arith.constant 0 : index
    %4 = vector.load %arg0[%c96, %c0_4] : memref<120x24xf32, #tpu.memory_space<vmem>>, vector<1x24xf32>
    %c97 = arith.constant 97 : index
    %c0_5 = arith.constant 0 : index
    %5 = vector.load %arg0[%c97, %c0_5] : memref<120x24xf32, #tpu.memory_space<vmem>>, vector<1x24xf32>
    %c104 = arith.constant 104 : index
    %c0_6 = arith.constant 0 : index
    %6 = vector.load %arg0[%c104, %c0_6] : memref<120x24xf32, #tpu.memory_space<vmem>>, vector<6x3xf32>
    %c112 = arith.constant 112 : index
    %c0_7 = arith.constant 0 : index
    %7 = vector.load %arg0[%c112, %c0_7] : memref<120x24xf32, #tpu.memory_space<vmem>>, vector<1x3xf32>
    %cst = arith.constant dense<0.000000e+00> : vector<64x24xf32>
    %8 = tpu.matmul %0, %1, %cst {dimension_numbers = #tpu.dot_dimension_numbers<[1], [0], [0], [1], [0, 0, 1, 1], [], []>} : vector<64x4xf32>, vector<4x24xf32>, vector<64x24xf32> -> vector<64x24xf32>
    %9 = vector.broadcast %4 : vector<1x24xf32> to vector<64x24xf32>
    %10 = arith.addf %8, %9 : vector<64x24xf32>
    %11 = vector.shape_cast %5 : vector<1x24xf32> to vector<1x24xf32>
    %12 = vector.broadcast %11 : vector<1x24xf32> to vector<8x24xf32>
    %cst_8 = arith.constant 0.000000e+00 : f32
    %13 = vector.broadcast %cst_8 : f32 to vector<8x6xf32>
    %cst_9 = arith.constant 0.000000e+00 : f32
    %14 = vector.broadcast %cst_9 : f32 to vector<8x6xf32>
    %cst_10 = arith.constant 0.000000e+00 : f32
    %15 = vector.broadcast %cst_10 : f32 to vector<8x6xf32>
    %cst_11 = arith.constant 0.000000e+00 : f32
    %16 = vector.broadcast %cst_11 : f32 to vector<8x6xf32>
    %17 = vector.extract_strided_slice %10 {offsets = [0, 0], sizes = [8, 24], strides = [1, 1]} : vector<64x24xf32> to vector<8x24xf32>
    %cst_12 = arith.constant dense<0.000000e+00> : vector<8x24xf32>
    %18 = tpu.matmul %13, %2, %cst_12 {dimension_numbers = #tpu.dot_dimension_numbers<[1], [0], [0], [1], [0, 0, 1, 1], [], []>} : vector<8x6xf32>, vector<6x24xf32>, vector<8x24xf32> -> vector<8x24xf32>
    %19 = arith.addf %17, %18 : vector<8x24xf32>
    %20 = arith.negf %19 : vector<8x24xf32>
    %21 = math.exp %20 : vector<8x24xf32>
    %cst_13 = arith.constant 1.000000e+00 : f32
    %22 = vector.broadcast %cst_13 : f32 to vector<8x24xf32>
    %23 = arith.addf %22, %21 : vector<8x24xf32>
    %24 = arith.divf %22, %23 : vector<8x24xf32>
    %25 = math.tanh %19 : vector<8x24xf32>
    %26 = vector.extract_strided_slice %24 {offsets = [0, 0], sizes = [8, 6], strides = [1, 1]} : vector<8x24xf32> to vector<8x6xf32>
    %27 = vector.extract_strided_slice %24 {offsets = [0, 6], sizes = [8, 6], strides = [1, 1]} : vector<8x24xf32> to vector<8x6xf32>
    %28 = vector.extract_strided_slice %25 {offsets = [0, 12], sizes = [8, 6], strides = [1, 1]} : vector<8x24xf32> to vector<8x6xf32>
    %29 = vector.extract_strided_slice %24 {offsets = [0, 18], sizes = [8, 6], strides = [1, 1]} : vector<8x24xf32> to vector<8x6xf32>
    %30 = arith.mulf %27, %14 : vector<8x6xf32>
    %31 = arith.mulf %26, %28 : vector<8x6xf32>
    %32 = arith.addf %30, %31 : vector<8x6xf32>
    %33 = math.tanh %32 : vector<8x6xf32>
    %34 = arith.mulf %29, %33 : vector<8x6xf32>
    %35 = tpu.concatenate %34, %15 in 1 : vector<8x6xf32>, vector<8x6xf32> -> vector<8x12xf32>
    %cst_14 = arith.constant dense<0.000000e+00> : vector<8x24xf32>
    %36 = tpu.matmul %35, %3, %cst_14 {dimension_numbers = #tpu.dot_dimension_numbers<[1], [0], [0], [1], [0, 0, 1, 1], [], []>} : vector<8x12xf32>, vector<12x24xf32>, vector<8x24xf32> -> vector<8x24xf32>
    %37 = arith.addf %36, %12 : vector<8x24xf32>
    %38 = arith.negf %37 : vector<8x24xf32>
    %39 = math.exp %38 : vector<8x24xf32>
    %cst_15 = arith.constant 1.000000e+00 : f32
    %40 = vector.broadcast %cst_15 : f32 to vector<8x24xf32>
    %41 = arith.addf %40, %39 : vector<8x24xf32>
    %42 = arith.divf %40, %41 : vector<8x24xf32>
    %43 = math.tanh %37 : vector<8x24xf32>
    %44 = vector.extract_strided_slice %42 {offsets = [0, 0], sizes = [8, 6], strides = [1, 1]} : vector<8x24xf32> to vector<8x6xf32>
    %45 = vector.extract_strided_slice %42 {offsets = [0, 6], sizes = [8, 6], strides = [1, 1]} : vector<8x24xf32> to vector<8x6xf32>
    %46 = vector.extract_strided_slice %43 {offsets = [0, 12], sizes = [8, 6], strides = [1, 1]} : vector<8x24xf32> to vector<8x6xf32>
    %47 = vector.extract_strided_slice %42 {offsets = [0, 18], sizes = [8, 6], strides = [1, 1]} : vector<8x24xf32> to vector<8x6xf32>
    %48 = arith.mulf %45, %16 : vector<8x6xf32>
    %49 = arith.mulf %44, %46 : vector<8x6xf32>
    %50 = arith.addf %48, %49 : vector<8x6xf32>
    %51 = math.tanh %50 : vector<8x6xf32>
    %52 = arith.mulf %47, %51 : vector<8x6xf32>
    %53 = vector.extract_strided_slice %10 {offsets = [8, 0], sizes = [8, 24], strides = [1, 1]} : vector<64x24xf32> to vector<8x24xf32>
    %cst_16 = arith.constant dense<0.000000e+00> : vector<8x24xf32>
    %54 = tpu.matmul %34, %2, %cst_16 {dimension_numbers = #tpu.dot_dimension_numbers<[1], [0], [0], [1], [0, 0, 1, 1], [], []>} : vector<8x6xf32>, vector<6x24xf32>, vector<8x24xf32> -> vector<8x24xf32>
    %55 = arith.addf %53, %54 : vector<8x24xf32>
    %56 = arith.negf %55 : vector<8x24xf32>
    %57 = math.exp %56 : vector<8x24xf32>
    %cst_17 = arith.constant 1.000000e+00 : f32
    %58 = vector.broadcast %cst_17 : f32 to vector<8x24xf32>
    %59 = arith.addf %58, %57 : vector<8x24xf32>
    %60 = arith.divf %58, %59 : vector<8x24xf32>
    %61 = math.tanh %55 : vector<8x24xf32>
    %62 = vector.extract_strided_slice %60 {offsets = [0, 0], sizes = [8, 6], strides = [1, 1]} : vector<8x24xf32> to vector<8x6xf32>
    %63 = vector.extract_strided_slice %60 {offsets = [0, 6], sizes = [8, 6], strides = [1, 1]} : vector<8x24xf32> to vector<8x6xf32>
    %64 = vector.extract_strided_slice %61 {offsets = [0, 12], sizes = [8, 6], strides = [1, 1]} : vector<8x24xf32> to vector<8x6xf32>
    %65 = vector.extract_strided_slice %60 {offsets = [0, 18], sizes = [8, 6], strides = [1, 1]} : vector<8x24xf32> to vector<8x6xf32>
    %66 = arith.mulf %63, %32 : vector<8x6xf32>
    %67 = arith.mulf %62, %64 : vector<8x6xf32>
    %68 = arith.addf %66, %67 : vector<8x6xf32>
    %69 = math.tanh %68 : vector<8x6xf32>
    %70 = arith.mulf %65, %69 : vector<8x6xf32>
    %71 = tpu.concatenate %70, %52 in 1 : vector<8x6xf32>, vector<8x6xf32> -> vector<8x12xf32>
    %cst_18 = arith.constant dense<0.000000e+00> : vector<8x24xf32>
    %72 = tpu.matmul %71, %3, %cst_18 {dimension_numbers = #tpu.dot_dimension_numbers<[1], [0], [0], [1], [0, 0, 1, 1], [], []>} : vector<8x12xf32>, vector<12x24xf32>, vector<8x24xf32> -> vector<8x24xf32>
    %73 = arith.addf %72, %12 : vector<8x24xf32>
    %74 = arith.negf %73 : vector<8x24xf32>
    %75 = math.exp %74 : vector<8x24xf32>
    %cst_19 = arith.constant 1.000000e+00 : f32
    %76 = vector.broadcast %cst_19 : f32 to vector<8x24xf32>
    %77 = arith.addf %76, %75 : vector<8x24xf32>
    %78 = arith.divf %76, %77 : vector<8x24xf32>
    %79 = math.tanh %73 : vector<8x24xf32>
    %80 = vector.extract_strided_slice %78 {offsets = [0, 0], sizes = [8, 6], strides = [1, 1]} : vector<8x24xf32> to vector<8x6xf32>
    %81 = vector.extract_strided_slice %78 {offsets = [0, 6], sizes = [8, 6], strides = [1, 1]} : vector<8x24xf32> to vector<8x6xf32>
    %82 = vector.extract_strided_slice %79 {offsets = [0, 12], sizes = [8, 6], strides = [1, 1]} : vector<8x24xf32> to vector<8x6xf32>
    %83 = vector.extract_strided_slice %78 {offsets = [0, 18], sizes = [8, 6], strides = [1, 1]} : vector<8x24xf32> to vector<8x6xf32>
    %84 = arith.mulf %81, %50 : vector<8x6xf32>
    %85 = arith.mulf %80, %82 : vector<8x6xf32>
    %86 = arith.addf %84, %85 : vector<8x6xf32>
    %87 = math.tanh %86 : vector<8x6xf32>
    %88 = arith.mulf %83, %87 : vector<8x6xf32>
    %89 = vector.extract_strided_slice %10 {offsets = [16, 0], sizes = [8, 24], strides = [1, 1]} : vector<64x24xf32> to vector<8x24xf32>
    %cst_20 = arith.constant dense<0.000000e+00> : vector<8x24xf32>
    %90 = tpu.matmul %70, %2, %cst_20 {dimension_numbers = #tpu.dot_dimension_numbers<[1], [0], [0], [1], [0, 0, 1, 1], [], []>} : vector<8x6xf32>, vector<6x24xf32>, vector<8x24xf32> -> vector<8x24xf32>
    %91 = arith.addf %89, %90 : vector<8x24xf32>
    %92 = arith.negf %91 : vector<8x24xf32>
    %93 = math.exp %92 : vector<8x24xf32>
    %cst_21 = arith.constant 1.000000e+00 : f32
    %94 = vector.broadcast %cst_21 : f32 to vector<8x24xf32>
    %95 = arith.addf %94, %93 : vector<8x24xf32>
    %96 = arith.divf %94, %95 : vector<8x24xf32>
    %97 = math.tanh %91 : vector<8x24xf32>
    %98 = vector.extract_strided_slice %96 {offsets = [0, 0], sizes = [8, 6], strides = [1, 1]} : vector<8x24xf32> to vector<8x6xf32>
    %99 = vector.extract_strided_slice %96 {offsets = [0, 6], sizes = [8, 6], strides = [1, 1]} : vector<8x24xf32> to vector<8x6xf32>
    %100 = vector.extract_strided_slice %97 {offsets = [0, 12], sizes = [8, 6], strides = [1, 1]} : vector<8x24xf32> to vector<8x6xf32>
    %101 = vector.extract_strided_slice %96 {offsets = [0, 18], sizes = [8, 6], strides = [1, 1]} : vector<8x24xf32> to vector<8x6xf32>
    %102 = arith.mulf %99, %68 : vector<8x6xf32>
    %103 = arith.mulf %98, %100 : vector<8x6xf32>
    %104 = arith.addf %102, %103 : vector<8x6xf32>
    %105 = math.tanh %104 : vector<8x6xf32>
    %106 = arith.mulf %101, %105 : vector<8x6xf32>
    %107 = tpu.concatenate %106, %88 in 1 : vector<8x6xf32>, vector<8x6xf32> -> vector<8x12xf32>
    %cst_22 = arith.constant dense<0.000000e+00> : vector<8x24xf32>
    %108 = tpu.matmul %107, %3, %cst_22 {dimension_numbers = #tpu.dot_dimension_numbers<[1], [0], [0], [1], [0, 0, 1, 1], [], []>} : vector<8x12xf32>, vector<12x24xf32>, vector<8x24xf32> -> vector<8x24xf32>
    %109 = arith.addf %108, %12 : vector<8x24xf32>
    %110 = arith.negf %109 : vector<8x24xf32>
    %111 = math.exp %110 : vector<8x24xf32>
    %cst_23 = arith.constant 1.000000e+00 : f32
    %112 = vector.broadcast %cst_23 : f32 to vector<8x24xf32>
    %113 = arith.addf %112, %111 : vector<8x24xf32>
    %114 = arith.divf %112, %113 : vector<8x24xf32>
    %115 = math.tanh %109 : vector<8x24xf32>
    %116 = vector.extract_strided_slice %114 {offsets = [0, 0], sizes = [8, 6], strides = [1, 1]} : vector<8x24xf32> to vector<8x6xf32>
    %117 = vector.extract_strided_slice %114 {offsets = [0, 6], sizes = [8, 6], strides = [1, 1]} : vector<8x24xf32> to vector<8x6xf32>
    %118 = vector.extract_strided_slice %115 {offsets = [0, 12], sizes = [8, 6], strides = [1, 1]} : vector<8x24xf32> to vector<8x6xf32>
    %119 = vector.extract_strided_slice %114 {offsets = [0, 18], sizes = [8, 6], strides = [1, 1]} : vector<8x24xf32> to vector<8x6xf32>
    %120 = arith.mulf %117, %86 : vector<8x6xf32>
    %121 = arith.mulf %116, %118 : vector<8x6xf32>
    %122 = arith.addf %120, %121 : vector<8x6xf32>
    %123 = math.tanh %122 : vector<8x6xf32>
    %124 = arith.mulf %119, %123 : vector<8x6xf32>
    %125 = vector.extract_strided_slice %10 {offsets = [24, 0], sizes = [8, 24], strides = [1, 1]} : vector<64x24xf32> to vector<8x24xf32>
    %cst_24 = arith.constant dense<0.000000e+00> : vector<8x24xf32>
    %126 = tpu.matmul %106, %2, %cst_24 {dimension_numbers = #tpu.dot_dimension_numbers<[1], [0], [0], [1], [0, 0, 1, 1], [], []>} : vector<8x6xf32>, vector<6x24xf32>, vector<8x24xf32> -> vector<8x24xf32>
    %127 = arith.addf %125, %126 : vector<8x24xf32>
    %128 = arith.negf %127 : vector<8x24xf32>
    %129 = math.exp %128 : vector<8x24xf32>
    %cst_25 = arith.constant 1.000000e+00 : f32
    %130 = vector.broadcast %cst_25 : f32 to vector<8x24xf32>
    %131 = arith.addf %130, %129 : vector<8x24xf32>
    %132 = arith.divf %130, %131 : vector<8x24xf32>
    %133 = math.tanh %127 : vector<8x24xf32>
    %134 = vector.extract_strided_slice %132 {offsets = [0, 0], sizes = [8, 6], strides = [1, 1]} : vector<8x24xf32> to vector<8x6xf32>
    %135 = vector.extract_strided_slice %132 {offsets = [0, 6], sizes = [8, 6], strides = [1, 1]} : vector<8x24xf32> to vector<8x6xf32>
    %136 = vector.extract_strided_slice %133 {offsets = [0, 12], sizes = [8, 6], strides = [1, 1]} : vector<8x24xf32> to vector<8x6xf32>
    %137 = vector.extract_strided_slice %132 {offsets = [0, 18], sizes = [8, 6], strides = [1, 1]} : vector<8x24xf32> to vector<8x6xf32>
    %138 = arith.mulf %135, %104 : vector<8x6xf32>
    %139 = arith.mulf %134, %136 : vector<8x6xf32>
    %140 = arith.addf %138, %139 : vector<8x6xf32>
    %141 = math.tanh %140 : vector<8x6xf32>
    %142 = arith.mulf %137, %141 : vector<8x6xf32>
    %143 = tpu.concatenate %142, %124 in 1 : vector<8x6xf32>, vector<8x6xf32> -> vector<8x12xf32>
    %cst_26 = arith.constant dense<0.000000e+00> : vector<8x24xf32>
    %144 = tpu.matmul %143, %3, %cst_26 {dimension_numbers = #tpu.dot_dimension_numbers<[1], [0], [0], [1], [0, 0, 1, 1], [], []>} : vector<8x12xf32>, vector<12x24xf32>, vector<8x24xf32> -> vector<8x24xf32>
    %145 = arith.addf %144, %12 : vector<8x24xf32>
    %146 = arith.negf %145 : vector<8x24xf32>
    %147 = math.exp %146 : vector<8x24xf32>
    %cst_27 = arith.constant 1.000000e+00 : f32
    %148 = vector.broadcast %cst_27 : f32 to vector<8x24xf32>
    %149 = arith.addf %148, %147 : vector<8x24xf32>
    %150 = arith.divf %148, %149 : vector<8x24xf32>
    %151 = math.tanh %145 : vector<8x24xf32>
    %152 = vector.extract_strided_slice %150 {offsets = [0, 0], sizes = [8, 6], strides = [1, 1]} : vector<8x24xf32> to vector<8x6xf32>
    %153 = vector.extract_strided_slice %150 {offsets = [0, 6], sizes = [8, 6], strides = [1, 1]} : vector<8x24xf32> to vector<8x6xf32>
    %154 = vector.extract_strided_slice %151 {offsets = [0, 12], sizes = [8, 6], strides = [1, 1]} : vector<8x24xf32> to vector<8x6xf32>
    %155 = vector.extract_strided_slice %150 {offsets = [0, 18], sizes = [8, 6], strides = [1, 1]} : vector<8x24xf32> to vector<8x6xf32>
    %156 = arith.mulf %153, %122 : vector<8x6xf32>
    %157 = arith.mulf %152, %154 : vector<8x6xf32>
    %158 = arith.addf %156, %157 : vector<8x6xf32>
    %159 = math.tanh %158 : vector<8x6xf32>
    %160 = arith.mulf %155, %159 : vector<8x6xf32>
    %161 = vector.extract_strided_slice %10 {offsets = [32, 0], sizes = [8, 24], strides = [1, 1]} : vector<64x24xf32> to vector<8x24xf32>
    %cst_28 = arith.constant dense<0.000000e+00> : vector<8x24xf32>
    %162 = tpu.matmul %142, %2, %cst_28 {dimension_numbers = #tpu.dot_dimension_numbers<[1], [0], [0], [1], [0, 0, 1, 1], [], []>} : vector<8x6xf32>, vector<6x24xf32>, vector<8x24xf32> -> vector<8x24xf32>
    %163 = arith.addf %161, %162 : vector<8x24xf32>
    %164 = arith.negf %163 : vector<8x24xf32>
    %165 = math.exp %164 : vector<8x24xf32>
    %cst_29 = arith.constant 1.000000e+00 : f32
    %166 = vector.broadcast %cst_29 : f32 to vector<8x24xf32>
    %167 = arith.addf %166, %165 : vector<8x24xf32>
    %168 = arith.divf %166, %167 : vector<8x24xf32>
    %169 = math.tanh %163 : vector<8x24xf32>
    %170 = vector.extract_strided_slice %168 {offsets = [0, 0], sizes = [8, 6], strides = [1, 1]} : vector<8x24xf32> to vector<8x6xf32>
    %171 = vector.extract_strided_slice %168 {offsets = [0, 6], sizes = [8, 6], strides = [1, 1]} : vector<8x24xf32> to vector<8x6xf32>
    %172 = vector.extract_strided_slice %169 {offsets = [0, 12], sizes = [8, 6], strides = [1, 1]} : vector<8x24xf32> to vector<8x6xf32>
    %173 = vector.extract_strided_slice %168 {offsets = [0, 18], sizes = [8, 6], strides = [1, 1]} : vector<8x24xf32> to vector<8x6xf32>
    %174 = arith.mulf %171, %140 : vector<8x6xf32>
    %175 = arith.mulf %170, %172 : vector<8x6xf32>
    %176 = arith.addf %174, %175 : vector<8x6xf32>
    %177 = math.tanh %176 : vector<8x6xf32>
    %178 = arith.mulf %173, %177 : vector<8x6xf32>
    %179 = tpu.concatenate %178, %160 in 1 : vector<8x6xf32>, vector<8x6xf32> -> vector<8x12xf32>
    %cst_30 = arith.constant dense<0.000000e+00> : vector<8x24xf32>
    %180 = tpu.matmul %179, %3, %cst_30 {dimension_numbers = #tpu.dot_dimension_numbers<[1], [0], [0], [1], [0, 0, 1, 1], [], []>} : vector<8x12xf32>, vector<12x24xf32>, vector<8x24xf32> -> vector<8x24xf32>
    %181 = arith.addf %180, %12 : vector<8x24xf32>
    %182 = arith.negf %181 : vector<8x24xf32>
    %183 = math.exp %182 : vector<8x24xf32>
    %cst_31 = arith.constant 1.000000e+00 : f32
    %184 = vector.broadcast %cst_31 : f32 to vector<8x24xf32>
    %185 = arith.addf %184, %183 : vector<8x24xf32>
    %186 = arith.divf %184, %185 : vector<8x24xf32>
    %187 = math.tanh %181 : vector<8x24xf32>
    %188 = vector.extract_strided_slice %186 {offsets = [0, 0], sizes = [8, 6], strides = [1, 1]} : vector<8x24xf32> to vector<8x6xf32>
    %189 = vector.extract_strided_slice %186 {offsets = [0, 6], sizes = [8, 6], strides = [1, 1]} : vector<8x24xf32> to vector<8x6xf32>
    %190 = vector.extract_strided_slice %187 {offsets = [0, 12], sizes = [8, 6], strides = [1, 1]} : vector<8x24xf32> to vector<8x6xf32>
    %191 = vector.extract_strided_slice %186 {offsets = [0, 18], sizes = [8, 6], strides = [1, 1]} : vector<8x24xf32> to vector<8x6xf32>
    %192 = arith.mulf %189, %158 : vector<8x6xf32>
    %193 = arith.mulf %188, %190 : vector<8x6xf32>
    %194 = arith.addf %192, %193 : vector<8x6xf32>
    %195 = math.tanh %194 : vector<8x6xf32>
    %196 = arith.mulf %191, %195 : vector<8x6xf32>
    %197 = vector.extract_strided_slice %10 {offsets = [40, 0], sizes = [8, 24], strides = [1, 1]} : vector<64x24xf32> to vector<8x24xf32>
    %cst_32 = arith.constant dense<0.000000e+00> : vector<8x24xf32>
    %198 = tpu.matmul %178, %2, %cst_32 {dimension_numbers = #tpu.dot_dimension_numbers<[1], [0], [0], [1], [0, 0, 1, 1], [], []>} : vector<8x6xf32>, vector<6x24xf32>, vector<8x24xf32> -> vector<8x24xf32>
    %199 = arith.addf %197, %198 : vector<8x24xf32>
    %200 = arith.negf %199 : vector<8x24xf32>
    %201 = math.exp %200 : vector<8x24xf32>
    %cst_33 = arith.constant 1.000000e+00 : f32
    %202 = vector.broadcast %cst_33 : f32 to vector<8x24xf32>
    %203 = arith.addf %202, %201 : vector<8x24xf32>
    %204 = arith.divf %202, %203 : vector<8x24xf32>
    %205 = math.tanh %199 : vector<8x24xf32>
    %206 = vector.extract_strided_slice %204 {offsets = [0, 0], sizes = [8, 6], strides = [1, 1]} : vector<8x24xf32> to vector<8x6xf32>
    %207 = vector.extract_strided_slice %204 {offsets = [0, 6], sizes = [8, 6], strides = [1, 1]} : vector<8x24xf32> to vector<8x6xf32>
    %208 = vector.extract_strided_slice %205 {offsets = [0, 12], sizes = [8, 6], strides = [1, 1]} : vector<8x24xf32> to vector<8x6xf32>
    %209 = vector.extract_strided_slice %204 {offsets = [0, 18], sizes = [8, 6], strides = [1, 1]} : vector<8x24xf32> to vector<8x6xf32>
    %210 = arith.mulf %207, %176 : vector<8x6xf32>
    %211 = arith.mulf %206, %208 : vector<8x6xf32>
    %212 = arith.addf %210, %211 : vector<8x6xf32>
    %213 = math.tanh %212 : vector<8x6xf32>
    %214 = arith.mulf %209, %213 : vector<8x6xf32>
    %215 = tpu.concatenate %214, %196 in 1 : vector<8x6xf32>, vector<8x6xf32> -> vector<8x12xf32>
    %cst_34 = arith.constant dense<0.000000e+00> : vector<8x24xf32>
    %216 = tpu.matmul %215, %3, %cst_34 {dimension_numbers = #tpu.dot_dimension_numbers<[1], [0], [0], [1], [0, 0, 1, 1], [], []>} : vector<8x12xf32>, vector<12x24xf32>, vector<8x24xf32> -> vector<8x24xf32>
    %217 = arith.addf %216, %12 : vector<8x24xf32>
    %218 = arith.negf %217 : vector<8x24xf32>
    %219 = math.exp %218 : vector<8x24xf32>
    %cst_35 = arith.constant 1.000000e+00 : f32
    %220 = vector.broadcast %cst_35 : f32 to vector<8x24xf32>
    %221 = arith.addf %220, %219 : vector<8x24xf32>
    %222 = arith.divf %220, %221 : vector<8x24xf32>
    %223 = math.tanh %217 : vector<8x24xf32>
    %224 = vector.extract_strided_slice %222 {offsets = [0, 0], sizes = [8, 6], strides = [1, 1]} : vector<8x24xf32> to vector<8x6xf32>
    %225 = vector.extract_strided_slice %222 {offsets = [0, 6], sizes = [8, 6], strides = [1, 1]} : vector<8x24xf32> to vector<8x6xf32>
    %226 = vector.extract_strided_slice %223 {offsets = [0, 12], sizes = [8, 6], strides = [1, 1]} : vector<8x24xf32> to vector<8x6xf32>
    %227 = vector.extract_strided_slice %222 {offsets = [0, 18], sizes = [8, 6], strides = [1, 1]} : vector<8x24xf32> to vector<8x6xf32>
    %228 = arith.mulf %225, %194 : vector<8x6xf32>
    %229 = arith.mulf %224, %226 : vector<8x6xf32>
    %230 = arith.addf %228, %229 : vector<8x6xf32>
    %231 = math.tanh %230 : vector<8x6xf32>
    %232 = arith.mulf %227, %231 : vector<8x6xf32>
    %233 = vector.extract_strided_slice %10 {offsets = [48, 0], sizes = [8, 24], strides = [1, 1]} : vector<64x24xf32> to vector<8x24xf32>
    %cst_36 = arith.constant dense<0.000000e+00> : vector<8x24xf32>
    %234 = tpu.matmul %214, %2, %cst_36 {dimension_numbers = #tpu.dot_dimension_numbers<[1], [0], [0], [1], [0, 0, 1, 1], [], []>} : vector<8x6xf32>, vector<6x24xf32>, vector<8x24xf32> -> vector<8x24xf32>
    %235 = arith.addf %233, %234 : vector<8x24xf32>
    %236 = arith.negf %235 : vector<8x24xf32>
    %237 = math.exp %236 : vector<8x24xf32>
    %cst_37 = arith.constant 1.000000e+00 : f32
    %238 = vector.broadcast %cst_37 : f32 to vector<8x24xf32>
    %239 = arith.addf %238, %237 : vector<8x24xf32>
    %240 = arith.divf %238, %239 : vector<8x24xf32>
    %241 = math.tanh %235 : vector<8x24xf32>
    %242 = vector.extract_strided_slice %240 {offsets = [0, 0], sizes = [8, 6], strides = [1, 1]} : vector<8x24xf32> to vector<8x6xf32>
    %243 = vector.extract_strided_slice %240 {offsets = [0, 6], sizes = [8, 6], strides = [1, 1]} : vector<8x24xf32> to vector<8x6xf32>
    %244 = vector.extract_strided_slice %241 {offsets = [0, 12], sizes = [8, 6], strides = [1, 1]} : vector<8x24xf32> to vector<8x6xf32>
    %245 = vector.extract_strided_slice %240 {offsets = [0, 18], sizes = [8, 6], strides = [1, 1]} : vector<8x24xf32> to vector<8x6xf32>
    %246 = arith.mulf %243, %212 : vector<8x6xf32>
    %247 = arith.mulf %242, %244 : vector<8x6xf32>
    %248 = arith.addf %246, %247 : vector<8x6xf32>
    %249 = math.tanh %248 : vector<8x6xf32>
    %250 = arith.mulf %245, %249 : vector<8x6xf32>
    %251 = tpu.concatenate %250, %232 in 1 : vector<8x6xf32>, vector<8x6xf32> -> vector<8x12xf32>
    %cst_38 = arith.constant dense<0.000000e+00> : vector<8x24xf32>
    %252 = tpu.matmul %251, %3, %cst_38 {dimension_numbers = #tpu.dot_dimension_numbers<[1], [0], [0], [1], [0, 0, 1, 1], [], []>} : vector<8x12xf32>, vector<12x24xf32>, vector<8x24xf32> -> vector<8x24xf32>
    %253 = arith.addf %252, %12 : vector<8x24xf32>
    %254 = arith.negf %253 : vector<8x24xf32>
    %255 = math.exp %254 : vector<8x24xf32>
    %cst_39 = arith.constant 1.000000e+00 : f32
    %256 = vector.broadcast %cst_39 : f32 to vector<8x24xf32>
    %257 = arith.addf %256, %255 : vector<8x24xf32>
    %258 = arith.divf %256, %257 : vector<8x24xf32>
    %259 = math.tanh %253 : vector<8x24xf32>
    %260 = vector.extract_strided_slice %258 {offsets = [0, 0], sizes = [8, 6], strides = [1, 1]} : vector<8x24xf32> to vector<8x6xf32>
    %261 = vector.extract_strided_slice %258 {offsets = [0, 6], sizes = [8, 6], strides = [1, 1]} : vector<8x24xf32> to vector<8x6xf32>
    %262 = vector.extract_strided_slice %259 {offsets = [0, 12], sizes = [8, 6], strides = [1, 1]} : vector<8x24xf32> to vector<8x6xf32>
    %263 = vector.extract_strided_slice %258 {offsets = [0, 18], sizes = [8, 6], strides = [1, 1]} : vector<8x24xf32> to vector<8x6xf32>
    %264 = arith.mulf %261, %230 : vector<8x6xf32>
    %265 = arith.mulf %260, %262 : vector<8x6xf32>
    %266 = arith.addf %264, %265 : vector<8x6xf32>
    %267 = math.tanh %266 : vector<8x6xf32>
    %268 = arith.mulf %263, %267 : vector<8x6xf32>
    %269 = vector.extract_strided_slice %10 {offsets = [56, 0], sizes = [8, 24], strides = [1, 1]} : vector<64x24xf32> to vector<8x24xf32>
    %cst_40 = arith.constant dense<0.000000e+00> : vector<8x24xf32>
    %270 = tpu.matmul %250, %2, %cst_40 {dimension_numbers = #tpu.dot_dimension_numbers<[1], [0], [0], [1], [0, 0, 1, 1], [], []>} : vector<8x6xf32>, vector<6x24xf32>, vector<8x24xf32> -> vector<8x24xf32>
    %271 = arith.addf %269, %270 : vector<8x24xf32>
    %272 = arith.negf %271 : vector<8x24xf32>
    %273 = math.exp %272 : vector<8x24xf32>
    %cst_41 = arith.constant 1.000000e+00 : f32
    %274 = vector.broadcast %cst_41 : f32 to vector<8x24xf32>
    %275 = arith.addf %274, %273 : vector<8x24xf32>
    %276 = arith.divf %274, %275 : vector<8x24xf32>
    %277 = math.tanh %271 : vector<8x24xf32>
    %278 = vector.extract_strided_slice %276 {offsets = [0, 0], sizes = [8, 6], strides = [1, 1]} : vector<8x24xf32> to vector<8x6xf32>
    %279 = vector.extract_strided_slice %276 {offsets = [0, 6], sizes = [8, 6], strides = [1, 1]} : vector<8x24xf32> to vector<8x6xf32>
    %280 = vector.extract_strided_slice %277 {offsets = [0, 12], sizes = [8, 6], strides = [1, 1]} : vector<8x24xf32> to vector<8x6xf32>
    %281 = vector.extract_strided_slice %276 {offsets = [0, 18], sizes = [8, 6], strides = [1, 1]} : vector<8x24xf32> to vector<8x6xf32>
    %282 = arith.mulf %279, %248 : vector<8x6xf32>
    %283 = arith.mulf %278, %280 : vector<8x6xf32>
    %284 = arith.addf %282, %283 : vector<8x6xf32>
    %285 = math.tanh %284 : vector<8x6xf32>
    %286 = arith.mulf %281, %285 : vector<8x6xf32>
    %287 = tpu.concatenate %286, %268 in 1 : vector<8x6xf32>, vector<8x6xf32> -> vector<8x12xf32>
    %cst_42 = arith.constant dense<0.000000e+00> : vector<8x24xf32>
    %288 = tpu.matmul %287, %3, %cst_42 {dimension_numbers = #tpu.dot_dimension_numbers<[1], [0], [0], [1], [0, 0, 1, 1], [], []>} : vector<8x12xf32>, vector<12x24xf32>, vector<8x24xf32> -> vector<8x24xf32>
    %289 = arith.addf %288, %12 : vector<8x24xf32>
    %290 = arith.negf %289 : vector<8x24xf32>
    %291 = math.exp %290 : vector<8x24xf32>
    %cst_43 = arith.constant 1.000000e+00 : f32
    %292 = vector.broadcast %cst_43 : f32 to vector<8x24xf32>
    %293 = arith.addf %292, %291 : vector<8x24xf32>
    %294 = arith.divf %292, %293 : vector<8x24xf32>
    %295 = math.tanh %289 : vector<8x24xf32>
    %296 = vector.extract_strided_slice %294 {offsets = [0, 0], sizes = [8, 6], strides = [1, 1]} : vector<8x24xf32> to vector<8x6xf32>
    %297 = vector.extract_strided_slice %294 {offsets = [0, 6], sizes = [8, 6], strides = [1, 1]} : vector<8x24xf32> to vector<8x6xf32>
    %298 = vector.extract_strided_slice %295 {offsets = [0, 12], sizes = [8, 6], strides = [1, 1]} : vector<8x24xf32> to vector<8x6xf32>
    %299 = vector.extract_strided_slice %294 {offsets = [0, 18], sizes = [8, 6], strides = [1, 1]} : vector<8x24xf32> to vector<8x6xf32>
    %300 = arith.mulf %297, %266 : vector<8x6xf32>
    %301 = arith.mulf %296, %298 : vector<8x6xf32>
    %302 = arith.addf %300, %301 : vector<8x6xf32>
    %303 = math.tanh %302 : vector<8x6xf32>
    %304 = arith.mulf %299, %303 : vector<8x6xf32>
    %cst_44 = arith.constant dense<0.000000e+00> : vector<8x3xf32>
    %305 = tpu.matmul %304, %6, %cst_44 {dimension_numbers = #tpu.dot_dimension_numbers<[1], [0], [0], [1], [0, 0, 1, 1], [], []>} : vector<8x6xf32>, vector<6x3xf32>, vector<8x3xf32> -> vector<8x3xf32>
    %306 = vector.broadcast %7 : vector<1x3xf32> to vector<8x3xf32>
    %307 = arith.addf %305, %306 : vector<8x3xf32>
    %c0_45 = arith.constant 0 : index
    %c0_46 = arith.constant 0 : index
    %308 = vector.load %arg1[%c0_45, %c0_46] : memref<8x3xf32, #tpu.memory_space<vmem>>, vector<8x3xf32>
    tpu.vector_store %arg1[%c0_45, %c0_46], %307 {strides = array<i32>} : memref<8x3xf32, #tpu.memory_space<vmem>>, vector<8x3xf32>,
    return
  }
}

</mosaic_0001>

<bundles_post_ra>
// kernel: lstm_forward.1
= control target key start
LH: loop header
LB: loop body
LE: loop exit
PB: predicated region body
PF: predicated region fallthrough
CT: control target
= control target key end

     0   :  { %vm53_vm0 = vcmask 1043456   ;;  %vm28_vm1 = vcmask 31744   ;;  %v2279_v2 = vmov 0.0   ;;  %vm170_vm2 = vcmask 1045504   ;;  %s2281_s16 = smov 116   ;;  %s2282_s17 = smov 6   ;;  %s2595_s0 = inlined_call_operand.vmem [shape: f32[120,24], index: 0, kind: input, shape index: {}]   ;;  %s2596_s1 = inlined_call_operand.vmem [shape: f32[8,3], index: 1, kind: output, shape index: {}]  }
   0x1   :  { %v16_v0 = vld [vmem:[%s2595_s0 + $0x40] sm:$0xf]  ;;  %2010 = vmatprep.subr.mxu1 %v2279_v2  ;;  %v9_v3 = vld [vmem:[%s2595_s0 + $0x8] sm:$0xff]  ;;  %vm2280_vm3 = vmmov 0   ;;  %vm2283_vm4 = vmmov 1   ;;  %v18_v23 = vld [vmem:[%s2595_s0 + $0x50] sm:$0xff] }
   0x2   :  { %v8_v1 = vld [vmem:[%s2595_s0] sm:$0xff]  ;;  %1996 = vmatprep.subr.msk.mxu0 %vm53_vm0, %v16_v0  ;;  %v2312_v4 = vld [vmem:[%s2595_s0 + $0x48] sm:$0x3f]  ;;  %2012 = vmatprep.mubr.msk.f32.mxu1 %vm2280_vm3, %v2279_v2  ;;  %vm2338_vm5 = vmpackc.low %vm53_vm0, %vm2283_vm4  ;;  %v2284_v25 = vmov 0.0|0.0   ;;  %s2285_s22 = smov 12   ;;  %s2286_s23 = smov 110  }
   0x3   :  { %1998 = vmatprep.mubr.msk.f32.mxu0 %vm28_vm1, %v8_v1  ;;  %1997 = vmatpush3.msk.msra.mxu0 %vm53_vm0, %v16_v0  ;;  %v2330_v5 = vld [vmem:[%s2595_s0 + $0x60] ss:$0 sm:$0xff]  ;;  %v19_v24 = vld [vmem:[%s2595_s0 + $0x58] sm:$0xf]  ;;  %vm166_vm6 = vcmask 48128   ;;  %vm274_vm7 = vcmask 97280  }
   0x4   :  { %2011 = vmatpush3.msk.msra.mxu1 %vm170_vm2, %v2312_v4  ;;  %1999 = vmatmul.mubr.msk.f32.vlgmr.msra.gmra.mrb[0].mxu0 %vm28_vm1, %v9_v3  ;;  %v2350_v26 = vpack.c.bf16 %v19_v24, %v18_v23  ;;  %v2375_v32 = vld [vmem:[%s2595_s0 + $0x61] ss:$0 sm:$0xff]  ;;  %v10_v60 = vld [vmem:[%s2595_s0 + $0x10] sm:$0xff]  ;;  %v11_v61 = vld [vmem:[%s2595_s0 + $0x18] sm:$0xff]  ;;  %vm1878_vm8 = vcmask 23552  }
   0x5   :  { %2013 = vmatmul.mubr.f32.vlgmr.msra.gmra.mrb[0].mxu1 %v2279_v2  ;;  %2034 = vmatprep.subr.mxu0 %v2279_v2  ;;  %v12_v62 = vld [vmem:[%s2595_s0 + $0x20] sm:$0xff]  ;;  %v13_v63 = vld [vmem:[%s2595_s0 + $0x28] sm:$0xff]  ;;  %v14_v0 = vld [vmem:[%s2595_s0 + $0x30] sm:$0xff] }
   0x6   :  { %2019 = vmatprep.mubr.msk.f32.mxu1 %vm2280_vm3, %v2279_v2  ;;  %2035 = vmatpush3.msk.msra.mxu0 %vm170_vm2, %v2312_v4 }
   0x7   :  { %2046 = vmatprep.subr.mxu0 %v2279_v2  ;;  %2111 = vmatprep.subr.bf16.mxu1 %v2284_v25 }
   0x8   :  { %2114 = vmatpush3.bf16.msk.msra.mxu1 %vm2338_vm5, %v2350_v26  ;;  %2001 = vmatprep.mubr.msk.f32.mxu0 %vm28_vm1, %v10_v60 }
   0x9   :  { %2022 = vmatprep.subr.mxu1 %v2279_v2  ;;  %2002 = vmatmul.mubr.msk.f32.gmra.mrb[2].mxu0 %vm28_vm1, %v11_v61 }
   0xa   :  { %2004 = vmatprep.mubr.msk.f32.mxu0 %vm28_vm1, %v12_v62 }
   0xd   :  { %2005 = vmatmul.mubr.msk.f32.gmra.mrb[4].mxu0 %vm28_vm1, %v13_v63 }
   0xe   :  { %2007 = vmatprep.mubr.msk.f32.mxu0 %vm28_vm1, %v14_v0 }
  0xd7   :  { %v2000_v6 = vpop.f32.mrb[0].mxu0 }
  0xd8   :  { %v123_v7 = vpop.f32.mrb[1].mxu0  ;;  %v240_v8 = vpop.f32.mrb[0].mxu1  ;;  %v129_v36 = vadd.f32 %v2000_v6, %v2330_v5  ;;  %v15_v6 = vld [vmem:[%s2595_s0 + $0x38] sm:$0xff] }
  0xd9   :  { %v124_v9 = vadd.f32 %v2330_v5, %v123_v7  ;;  %v2014_v10 = vpop.f32.mrb[1].mxu1  ;;  %2008 = vmatmul.mubr.msk.f32.gmra.mrb[6].mxu0 %vm28_vm1, %v15_v6 }
  0xda   :  { %2036 = vmatprep.mubr.msk.f32.mxu0 %vm2280_vm3, %v2279_v2 }
  0xdb   :  { %v244_v11 = vadd.f32 %v240_v8, %v124_v9 }
  0xdd   :  { %2151 = vtanh.f32 %v244_v11  ;;  %v1896_v13 = vmul.f32 -1.442695, %v244_v11  ;;  %v2420_v11 = vpop.f32.mrb[2].mxu0 }
  0xde   :  { %v139_v60 = vadd.f32 %v2420_v11, %v2330_v5 }
  0xdf   :  { %2153 = vpow2.f32 %v1896_v13 }
  0xe7   :  { %v2152_v12 = vpop.eup %2151 }
  0xe8   :  { %254 = vrot.lane.b32.xlu0 %v2152_v12, %s2281_s16  ;;  %v133_v12 = vpop.f32.mrb[3].mxu0 }
  0xe9   :  { %v2154_v14 = vpop.eup %2153  ;;  %v2422_v13 = vpop.f32.mrb[4].mxu0 }
  0xea   :  { %v248_v15 = vadd.f32 1.0, %v2154_v14  ;;  %v2424_v14 = vpop.f32.mrb[5].mxu0 }
  0xec   :  { %2155 = vrcp.f32 %v248_v15 }
  0xf6   :  { %v2156_v16 = vpop.eup %2155 }
  0xf7   :  { %v252_v19 = vmul.f32 0.0, %v2156_v16 }
 0x15a   :  { %v255_v17 = vpop.permute.xlu0 %254 }
 0x15b   :  { %v257_v18 = vmul.f32 %v2156_v16, %v255_v17 }
 0x15d   :  { %259 = vrot.lane.b32.xlu0 %v257_v18, %s2282_s17 }
 0x1ac   :  { %v2440_v18 = vpop.f32.mrb[6].mxu0 }
 0x1cf   :  { %v260_v20 = vpop.permute.xlu0 %259 }
 0x1d0   :  { %v2335_v21 = vadd.f32 %v260_v20, %v252_v19  ;;  %v2442_v19 = vpop.f32.mrb[7].mxu0  ;;  %v134_v20 = vadd.f32 %v2330_v5, %v133_v12 }
 0x1d2   :  { %2157 = vtanh.f32 %v2335_v21 }
 0x1dc   :  { %v2158_v27 = vpop.eup %2157 }
 0x1dd   :  { %265 = vrot.lane.b32.xlu1 %v2158_v27, %s2285_s22 }
 0x24f   :  { %v266_v28 = vpop.permute.xlu1 %265 }
 0x250   :  { %v268_v29 = vmul.f32 %v2156_v16, %v266_v28 }
 0x252   :  { %270 = vrot.lane.b32.xlu1 %v268_v29, %s2286_s23 }
 0x2c4   :  { %v271_v30 = vpop.permute.xlu1 %270 }
 0x2c5   :  { %v273_v31 = vsel %vm166_vm6, %v271_v30, 0.0 }
 0x2c6   :  { %2020 = vmatmul.mubr.msk.f32.vlgmr.msra.gmra.mrb[2].mxu1 %vm274_vm7, %v273_v31 }
 0x2c7   :  { %2023 = vmatpush3.msk.msra.mxu1 %vm170_vm2, %v2312_v4  ;;  %2024 = vmatprep.mubr.msk.f32.mxu1 %vm2280_vm3, %v2279_v2 }
 0x2c8   :  { %2115 = vmatprep.subr.bf16.mxu1 %v2284_v25 }
 0x2ca   :  { %2025 = vmatmul.mubr.msk.f32.vlgmr.msra.gmra.mrb[4].mxu1 %vm166_vm6, %v271_v30 }
 0x2cb   :  { %2118 = vmatpush3.bf16.msk.msra.mxu1 %vm2338_vm5, %v2350_v26  ;;  %2031 = vmatprep.mubr.msk.f32.mxu1 %vm2280_vm3, %v2279_v2 }
 0x2cc   :  { %2119 = vmatprep.subr.bf16.mxu1 %v2284_v25 }
 0x399   :  { %v347_v33 = vpop.f32.mrb[2].mxu1 }
 0x39a   :  { %v348_v34 = vadd.f32 %v2375_v32, %v347_v33  ;;  %v2021_v35 = vpop.f32.mrb[3].mxu1 }
 0x39c   :  { %2159 = vtanh.f32 %v348_v34  ;;  %v1899_v42 = vmul.f32 -1.442695, %v348_v34 }
 0x39d   :  { %v443_v37 = vpop.f32.mrb[4].mxu1 }
 0x39e   :  { %v447_v38 = vadd.f32 %v443_v37, %v129_v36  ;;  %v2026_v39 = vpop.f32.mrb[5].mxu1 }
 0x3a0   :  { %2161 = vtanh.f32 %v447_v38  ;;  %v1902_v43 = vmul.f32 -1.442695, %v447_v38 }
 0x3a1   :  { %2163 = vpow2.f32 %v1899_v42 }
 0x3a2   :  { %2165 = vpow2.f32 %v1902_v43 }
 0x3a6   :  { %v2160_v40 = vpop.eup %2159 }
 0x3a7   :  { %360 = vrot.lane.b32.xlu0 %v2160_v40, %s2281_s16 }
 0x3aa   :  { %v2162_v41 = vpop.eup %2161 }
 0x3ab   :  { %457 = vrot.lane.b32.xlu1 %v2162_v41, %s2281_s16  ;;  %v2164_v44 = vpop.eup %2163 }
 0x3ac   :  { %v354_v45 = vadd.f32 1.0, %v2164_v44  ;;  %v2166_v46 = vpop.eup %2165 }
 0x3ad   :  { %v451_v47 = vadd.f32 1.0, %v2166_v46 }
 0x3ae   :  { %2167 = vrcp.f32 %v354_v45 }
 0x3af   :  { %2169 = vrcp.f32 %v451_v47 }
 0x3b8   :  { %v2168_v48 = vpop.eup %2167 }
 0x3b9   :  { %v2170_v51 = vpop.eup %2169  ;;  %v358_v54 = vmul.f32 0.0, %v2168_v48 }
 0x3ba   :  { %v455_v57 = vmul.f32 %v2170_v51, %v2335_v21 }
 0x419   :  { %v361_v49 = vpop.permute.xlu0 %360 }
 0x41a   :  { %v363_v50 = vmul.f32 %v2168_v48, %v361_v49 }
 0x41c   :  { %365 = vrot.lane.b32.xlu0 %v363_v50, %s2282_s17 }
 0x41d   :  { %v458_v52 = vpop.permute.xlu1 %457 }
 0x41e   :  { %v460_v53 = vmul.f32 %v2170_v51, %v458_v52 }
 0x420   :  { %462 = vrot.lane.b32.xlu1 %v460_v53, %s2282_s17 }
 0x48e   :  { %v366_v55 = vpop.permute.xlu0 %365 }
 0x48f   :  { %v2383_v56 = vadd.f32 %v366_v55, %v358_v54 }
 0x491   :  { %2171 = vtanh.f32 %v2383_v56 }
 0x492   :  { %v463_v58 = vpop.permute.xlu1 %462 }
 0x493   :  { %v2387_v59 = vadd.f32 %v463_v58, %v455_v57 }
 0x495   :  { %2173 = vtanh.f32 %v2387_v59 }
 0x49b   :  { %v2172_v1 = vpop.eup %2171 }
 0x49c   :  { %371 = vrot.lane.b32.xlu0 %v2172_v1, %s2285_s22 }
 0x49f   :  { %v2174_v3 = vpop.eup %2173 }
 0x4a0   :  { %468 = vrot.lane.b32.xlu1 %v2174_v3, %s2285_s22 }
 0x50e   :  { %v372_v7 = vpop.permute.xlu0 %371 }
 0x50f   :  { %v374_v8 = vmul.f32 %v2168_v48, %v372_v7 }
 0x511   :  { %477 = vrot.lane.b32.xlu1 %v374_v8, %s2281_s16 }
 0x512   :  { %v469_v9 = vpop.permute.xlu1 %468 }
 0x513   :  { %v471_v10 = vmul.f32 %v2170_v51, %v469_v9 }
 0x515   :  { %473 = vrot.lane.b32.xlu0 %v471_v10, %s2286_s23 }
 0x583   :  { %v478_v15 = vpop.permute.xlu1 %477 }
 0x587   :  { %v474_v16 = vpop.permute.xlu0 %473 }
 0x588   :  { %v480_v17 = vsel %vm166_vm6, %v474_v16, %v478_v15  ;;  %2037 = vmatmul.mubr.msk.f32.vlgmr.msra.gmra.mrb[8].mxu0 %vm166_vm6, %v474_v16 }
 0x589   :  { %2032 = vmatmul.mubr.msk.f32.vlgmr.msra.gmra.mrb[6].mxu1 %vm274_vm7, %v480_v17  ;;  %2047 = vmatpush3.msk.msra.mxu0 %vm170_vm2, %v2312_v4 }
 0x58a   :  { %2122 = vmatpush3.bf16.msk.msra.mxu1 %vm2338_vm5, %v2350_v26  ;;  %2048 = vmatprep.mubr.msk.f32.mxu0 %vm2280_vm3, %v2279_v2 }
 0x58b   :  { %2043 = vmatprep.mubr.msk.f32.mxu1 %vm2280_vm3, %v2279_v2  ;;  %2123 = vmatprep.subr.bf16.mxu1 %v2284_v25 }
 0x58c   :  { %2058 = vmatprep.subr.mxu0 %v2279_v2 }
 0x65b   :  { %v646_v21 = vpop.f32.mrb[8].mxu0 }
 0x65c   :  { %v650_v23 = vadd.f32 %v646_v21, %v134_v20  ;;  %v550_v24 = vpop.f32.mrb[6].mxu1  ;;  %v2038_v27 = vpop.f32.mrb[9].mxu0 }
 0x65d   :  { %v551_v28 = vadd.f32 %v2375_v32, %v550_v24  ;;  %v2033_v29 = vpop.f32.mrb[7].mxu1 }
 0x65e   :  { %2175 = vtanh.f32 %v650_v23  ;;  %v1908_v33 = vmul.f32 -1.442695, %v650_v23 }
 0x65f   :  { %2177 = vtanh.f32 %v551_v28  ;;  %v1905_v34 = vmul.f32 -1.442695, %v551_v28 }
 0x660   :  { %2179 = vpow2.f32 %v1908_v33 }
 0x661   :  { %2181 = vpow2.f32 %v1905_v34 }
 0x668   :  { %v2176_v30 = vpop.eup %2175 }
 0x669   :  { %v2178_v31 = vpop.eup %2177  ;;  %660 = vrot.lane.b32.xlu1 %v2176_v30, %s2281_s16 }
 0x66a   :  { %563 = vrot.lane.b32.xlu0 %v2178_v31, %s2281_s16  ;;  %v2180_v35 = vpop.eup %2179 }
 0x66b   :  { %v2182_v36 = vpop.eup %2181  ;;  %v654_v37 = vadd.f32 1.0, %v2180_v35 }
 0x66c   :  { %v557_v38 = vadd.f32 1.0, %v2182_v36 }
 0x66d   :  { %2183 = vrcp.f32 %v654_v37 }
 0x66e   :  { %2185 = vrcp.f32 %v557_v38 }
 0x677   :  { %v2184_v39 = vpop.eup %2183 }
 0x678   :  { %v2186_v41 = vpop.eup %2185  ;;  %v658_v45 = vmul.f32 %v2184_v39, %v2387_v59 }
 0x679   :  { %v561_v47 = vmul.f32 %v2186_v41, %v2383_v56 }
 0x6db   :  { %v661_v40 = vpop.permute.xlu1 %660 }
 0x6dc   :  { %v663_v42 = vmul.f32 %v2184_v39, %v661_v40  ;;  %v564_v43 = vpop.permute.xlu0 %563 }
 0x6dd   :  { %v566_v44 = vmul.f32 %v2186_v41, %v564_v43  ;;  %v144_v43 = vadd.f32 %v2330_v5, %v2424_v14 }
 0x6de   :  { %665 = vrot.lane.b32.xlu1 %v663_v42, %s2282_s17 }
 0x6df   :  { %568 = vrot.lane.b32.xlu0 %v566_v44, %s2282_s17 }
 0x750   :  { %v666_v46 = vpop.permute.xlu1 %665 }
 0x751   :  { %v668_v48 = vadd.f32 %v666_v46, %v658_v45  ;;  %v569_v49 = vpop.permute.xlu0 %568 }
 0x752   :  { %v571_v50 = vadd.f32 %v569_v49, %v561_v47 }
 0x753   :  { %2187 = vtanh.f32 %v668_v48 }
 0x754   :  { %2189 = vtanh.f32 %v571_v50 }
 0x75d   :  { %v2188_v51 = vpop.eup %2187 }
 0x75e   :  { %v2190_v52 = vpop.eup %2189  ;;  %671 = vrot.lane.b32.xlu1 %v2188_v51, %s2285_s22 }
 0x75f   :  { %574 = vrot.lane.b32.xlu0 %v2190_v52, %s2285_s22 }
 0x7d0   :  { %v672_v53 = vpop.permute.xlu1 %671 }
 0x7d1   :  { %v674_v54 = vmul.f32 %v2184_v39, %v672_v53  ;;  %v575_v55 = vpop.permute.xlu0 %574 }
 0x7d2   :  { %v577_v57 = vmul.f32 %v2186_v41, %v575_v55 }
 0x7d3   :  { %676 = vrot.lane.b32.xlu0 %v674_v54, %s2286_s23 }
 0x7d4   :  { %680 = vrot.lane.b32.xlu1 %v577_v57, %s2281_s16 }
 0x845   :  { %v677_v56 = vpop.permute.xlu0 %676 }
 0x846   :  { %v681_v58 = vpop.permute.xlu1 %680  ;;  %2049 = vmatmul.mubr.msk.f32.vlgmr.msra.gmra.mrb[10].mxu0 %vm166_vm6, %v677_v56 }
 0x847   :  { %v683_v59 = vsel %vm166_vm6, %v677_v56, %v681_v58  ;;  %2059 = vmatpush3.msk.msra.mxu0 %vm170_vm2, %v2312_v4  ;;  %2060 = vmatprep.mubr.msk.f32.mxu0 %vm2280_vm3, %v2279_v2 }
 0x848   :  { %2044 = vmatmul.mubr.msk.f32.vlgmr.msra.gmra.mrb[8].mxu1 %vm274_vm7, %v683_v59  ;;  %2070 = vmatprep.subr.mxu0 %v2279_v2 }
 0x849   :  { %2126 = vmatpush3.bf16.msk.msra.mxu1 %vm2338_vm5, %v2350_v26  ;;  %2055 = vmatprep.mubr.msk.f32.mxu1 %vm2280_vm3, %v2279_v2 }
 0x84a   :  { %2127 = vmatprep.subr.bf16.mxu1 %v2284_v25 }
 0x919   :  { %v849_v61 = vpop.f32.mrb[10].mxu0 }
 0x91a   :  { %v853_v62 = vadd.f32 %v849_v61, %v139_v60  ;;  %v2050_v63 = vpop.f32.mrb[11].mxu0 }
 0x91b   :  { %v753_v0 = vpop.f32.mrb[8].mxu1 }
 0x91c   :  { %2191 = vtanh.f32 %v853_v62  ;;  %v754_v1 = vadd.f32 %v2375_v32, %v753_v0  ;;  %v2045_v3 = vpop.f32.mrb[9].mxu1  ;;  %v1914_v8 = vmul.f32 -1.442695, %v853_v62 }
 0x91e   :  { %2193 = vtanh.f32 %v754_v1  ;;  %v1911_v9 = vmul.f32 -1.442695, %v754_v1 }
 0x91f   :  { %2195 = vpow2.f32 %v1914_v8 }
 0x920   :  { %2197 = vpow2.f32 %v1911_v9 }
 0x926   :  { %v2192_v6 = vpop.eup %2191 }
 0x927   :  { %863 = vrot.lane.b32.xlu1 %v2192_v6, %s2281_s16 }
 0x928   :  { %v2194_v7 = vpop.eup %2193 }
 0x929   :  { %766 = vrot.lane.b32.xlu0 %v2194_v7, %s2281_s16  ;;  %v2196_v10 = vpop.eup %2195 }
 0x92a   :  { %v2198_v11 = vpop.eup %2197  ;;  %v857_v12 = vadd.f32 1.0, %v2196_v10 }
 0x92b   :  { %v760_v15 = vadd.f32 1.0, %v2198_v11 }
 0x92c   :  { %2199 = vrcp.f32 %v857_v12 }
 0x92d   :  { %2201 = vrcp.f32 %v760_v15 }
 0x936   :  { %v2200_v16 = vpop.eup %2199 }
 0x937   :  { %v2202_v21 = vpop.eup %2201  ;;  %v861_v27 = vmul.f32 %v2200_v16, %v668_v48 }
 0x938   :  { %v764_v30 = vmul.f32 %v2202_v21, %v571_v50 }
 0x999   :  { %v864_v17 = vpop.permute.xlu1 %863 }
 0x99a   :  { %v866_v20 = vmul.f32 %v2200_v16, %v864_v17 }
 0x99b   :  { %v767_v23 = vpop.permute.xlu0 %766 }
 0x99c   :  { %868 = vrot.lane.b32.xlu1 %v866_v20, %s2282_s17  ;;  %v769_v24 = vmul.f32 %v2202_v21, %v767_v23 }
 0x99e   :  { %771 = vrot.lane.b32.xlu0 %v769_v24, %s2282_s17 }
 0xa0e   :  { %v869_v28 = vpop.permute.xlu1 %868 }
 0xa0f   :  { %v871_v29 = vadd.f32 %v869_v28, %v861_v27 }
 0xa10   :  { %v772_v31 = vpop.permute.xlu0 %771 }
 0xa11   :  { %2203 = vtanh.f32 %v871_v29  ;;  %v774_v33 = vadd.f32 %v772_v31, %v764_v30 }
 0xa13   :  { %2205 = vtanh.f32 %v774_v33 }
 0xa1b   :  { %v2204_v34 = vpop.eup %2203 }
 0xa1c   :  { %874 = vrot.lane.b32.xlu1 %v2204_v34, %s2285_s22 }
 0xa1d   :  { %v2206_v35 = vpop.eup %2205 }
 0xa1e   :  { %777 = vrot.lane.b32.xlu0 %v2206_v35, %s2285_s22 }
 0xa8e   :  { %v875_v36 = vpop.permute.xlu1 %874 }
 0xa8f   :  { %v877_v37 = vmul.f32 %v2200_v16, %v875_v36 }
 0xa90   :  { %v778_v38 = vpop.permute.xlu0 %777 }
 0xa91   :  { %879 = vrot.lane.b32.xlu0 %v877_v37, %s2286_s23  ;;  %v780_v39 = vmul.f32 %v2202_v21, %v778_v38  ;;  %v149_v21 = vadd.f32 %v2422_v13, %v2330_v5 }
 0xa93   :  { %883 = vrot.lane.b32.xlu1 %v780_v39, %s2281_s16 }
 0xb03   :  { %v880_v40 = vpop.permute.xlu0 %879 }
 0xb04   :  { %2061 = vmatmul.mubr.msk.f32.vlgmr.msra.gmra.mrb[12].mxu0 %vm166_vm6, %v880_v40 }
 0xb05   :  { %2071 = vmatpush3.msk.msra.mxu0 %vm170_vm2, %v2312_v4  ;;  %2072 = vmatprep.mubr.msk.f32.mxu0 %vm2280_vm3, %v2279_v2  ;;  %v884_v41 = vpop.permute.xlu1 %883 }
 0xb06   :  { %2082 = vmatprep.subr.mxu0 %v2279_v2  ;;  %v886_v42 = vsel %vm166_vm6, %v880_v40, %v884_v41 }
 0xb07   :  { %2056 = vmatmul.mubr.msk.f32.vlgmr.msra.gmra.mrb[10].mxu1 %vm274_vm7, %v886_v42 }
 0xb08   :  { %2130 = vmatpush3.bf16.msk.msra.mxu1 %vm2338_vm5, %v2350_v26  ;;  %2067 = vmatprep.mubr.msk.f32.mxu1 %vm2280_vm3, %v2279_v2 }
 0xb09   :  { %2131 = vmatprep.subr.bf16.mxu1 %v2284_v25 }
 0xbd7   :  { %v1052_v44 = vpop.f32.mrb[12].mxu0 }
 0xbd8   :  { %v1056_v45 = vadd.f32 %v1052_v44, %v144_v43  ;;  %v2062_v46 = vpop.f32.mrb[13].mxu0 }
 0xbda   :  { %2207 = vtanh.f32 %v1056_v45  ;;  %v956_v47 = vpop.f32.mrb[10].mxu1  ;;  %v1920_v52 = vmul.f32 -1.442695, %v1056_v45 }
 0xbdb   :  { %v957_v48 = vadd.f32 %v2375_v32, %v956_v47  ;;  %v2057_v49 = vpop.f32.mrb[11].mxu1 }
 0xbdd   :  { %2209 = vtanh.f32 %v957_v48  ;;  %v1917_v53 = vmul.f32 -1.442695, %v957_v48 }
 0xbde   :  { %2211 = vpow2.f32 %v1920_v52 }
 0xbdf   :  { %2213 = vpow2.f32 %v1917_v53 }
 0xbe4   :  { %v2208_v50 = vpop.eup %2207 }
 0xbe5   :  { %1066 = vrot.lane.b32.xlu1 %v2208_v50, %s2281_s16 }
 0xbe7   :  { %v2210_v51 = vpop.eup %2209 }
 0xbe8   :  { %969 = vrot.lane.b32.xlu0 %v2210_v51, %s2281_s16  ;;  %v2212_v14 = vpop.eup %2211 }
 0xbe9   :  { %v1060_v54 = vadd.f32 1.0, %v2212_v14  ;;  %v2214_v55 = vpop.eup %2213 }
 0xbea   :  { %v963_v57 = vadd.f32 1.0, %v2214_v55 }
 0xbeb   :  { %2215 = vrcp.f32 %v1060_v54 }
 0xbec   :  { %2217 = vrcp.f32 %v963_v57 }
 0xbf5   :  { %v2216_v56 = vpop.eup %2215 }
 0xbf6   :  { %v2218_v60 = vpop.eup %2217  ;;  %v1064_v63 = vmul.f32 %v2216_v56, %v871_v29 }
 0xbf7   :  { %v967_v3 = vmul.f32 %v2218_v60, %v774_v33 }
 0xc57   :  { %v1067_v58 = vpop.permute.xlu1 %1066 }
 0xc58   :  { %v1069_v59 = vmul.f32 %v2216_v56, %v1067_v58 }
 0xc5a   :  { %1071 = vrot.lane.b32.xlu1 %v1069_v59, %s2282_s17  ;;  %v970_v61 = vpop.permute.xlu0 %969 }
 0xc5b   :  { %v972_v62 = vmul.f32 %v2218_v60, %v970_v61 }
 0xc5d   :  { %974 = vrot.lane.b32.xlu0 %v972_v62, %s2282_s17 }
 0xccc   :  { %v1072_v0 = vpop.permute.xlu1 %1071 }
 0xccd   :  { %v1074_v1 = vadd.f32 %v1072_v0, %v1064_v63 }
 0xccf   :  { %2219 = vtanh.f32 %v1074_v1  ;;  %v975_v6 = vpop.permute.xlu0 %974 }
 0xcd0   :  { %v977_v7 = vadd.f32 %v975_v6, %v967_v3 }
 0xcd2   :  { %2221 = vtanh.f32 %v977_v7 }
 0xcd9   :  { %v2220_v8 = vpop.eup %2219 }
 0xcda   :  { %1077 = vrot.lane.b32.xlu1 %v2220_v8, %s2285_s22 }
 0xcdc   :  { %v2222_v9 = vpop.eup %2221 }
 0xcdd   :  { %980 = vrot.lane.b32.xlu0 %v2222_v9, %s2285_s22 }
 0xd4c   :  { %v1078_v10 = vpop.permute.xlu1 %1077 }
 0xd4d   :  { %v1080_v11 = vmul.f32 %v2216_v56, %v1078_v10 }
 0xd4f   :  { %1082 = vrot.lane.b32.xlu0 %v1080_v11, %s2286_s23  ;;  %v981_v12 = vpop.permute.xlu0 %980 }
 0xd50   :  { %v983_v15 = vmul.f32 %v2218_v60, %v981_v12 }
 0xd52   :  { %1086 = vrot.lane.b32.xlu1 %v983_v15, %s2281_s16 }
 0xdc1   :  { %v1083_v16 = vpop.permute.xlu0 %1082 }
 0xdc2   :  { %2073 = vmatmul.mubr.msk.f32.vlgmr.msra.gmra.mrb[14].mxu0 %vm166_vm6, %v1083_v16 }
 0xdc3   :  { %2083 = vmatpush3.msk.msra.mxu0 %vm170_vm2, %v2312_v4  ;;  %2084 = vmatprep.mubr.msk.f32.mxu0 %vm2280_vm3, %v2279_v2 }
 0xdc4   :  { %2094 = vmatprep.subr.mxu0 %v2279_v2  ;;  %v1087_v17 = vpop.permute.xlu1 %1086 }
 0xdc5   :  { %v1089_v20 = vsel %vm166_vm6, %v1083_v16, %v1087_v17 }
 0xdc6   :  { %2068 = vmatmul.mubr.msk.f32.vlgmr.msra.gmra.mrb[12].mxu1 %vm274_vm7, %v1089_v20 }
 0xdc7   :  { %2134 = vmatpush3.bf16.msk.msra.mxu1 %vm2338_vm5, %v2350_v26  ;;  %2079 = vmatprep.mubr.msk.f32.mxu1 %vm2280_vm3, %v2279_v2 }
 0xdc8   :  { %2135 = vmatprep.subr.bf16.mxu1 %v2284_v25 }
 0xe95   :  { %v1255_v23 = vpop.f32.mrb[14].mxu0 }
 0xe96   :  { %v1259_v24 = vadd.f32 %v1255_v23, %v149_v21  ;;  %v2074_v27 = vpop.f32.mrb[15].mxu0 }
 0xe98   :  { %2223 = vtanh.f32 %v1259_v24  ;;  %v1926_v34 = vmul.f32 -1.442695, %v1259_v24 }
 0xe99   :  { %v1159_v28 = vpop.f32.mrb[12].mxu1 }
 0xe9a   :  { %v1160_v29 = vadd.f32 %v2375_v32, %v1159_v28  ;;  %v2069_v30 = vpop.f32.mrb[13].mxu1 }
 0xe9c   :  { %2225 = vtanh.f32 %v1160_v29  ;;  %v1923_v35 = vmul.f32 -1.442695, %v1160_v29 }
 0xe9d   :  { %2227 = vpow2.f32 %v1926_v34 }
 0xe9e   :  { %2229 = vpow2.f32 %v1923_v35 }
 0xea2   :  { %v2224_v31 = vpop.eup %2223 }
 0xea3   :  { %1269 = vrot.lane.b32.xlu1 %v2224_v31, %s2281_s16 }
 0xea6   :  { %v2226_v33 = vpop.eup %2225 }
 0xea7   :  { %1172 = vrot.lane.b32.xlu0 %v2226_v33, %s2281_s16  ;;  %v2228_v13 = vpop.eup %2227 }
 0xea8   :  { %v1263_v36 = vadd.f32 1.0, %v2228_v13  ;;  %v2230_v37 = vpop.eup %2229 }
 0xea9   :  { %v1166_v38 = vadd.f32 1.0, %v2230_v37 }
 0xeaa   :  { %2231 = vrcp.f32 %v1263_v36 }
 0xeab   :  { %2233 = vrcp.f32 %v1166_v38  ;;  %v159_v38 = vadd.f32 %v2440_v18, %v2330_v5 }
 0xeb4   :  { %v2232_v39 = vpop.eup %2231 }
 0xeb5   :  { %v2234_v42 = vpop.eup %2233  ;;  %v1267_v45 = vmul.f32 %v2232_v39, %v1074_v1 }
 0xeb6   :  { %v1170_v48 = vmul.f32 %v2234_v42, %v977_v7 }
 0xf15   :  { %v1270_v40 = vpop.permute.xlu1 %1269 }
 0xf16   :  { %v1272_v41 = vmul.f32 %v2232_v39, %v1270_v40 }
 0xf18   :  { %1274 = vrot.lane.b32.xlu1 %v1272_v41, %s2282_s17 }
 0xf19   :  { %v1173_v43 = vpop.permute.xlu0 %1172 }
 0xf1a   :  { %v1175_v44 = vmul.f32 %v2234_v42, %v1173_v43 }
 0xf1c   :  { %1177 = vrot.lane.b32.xlu0 %v1175_v44, %s2282_s17 }
 0xf8a   :  { %v1275_v46 = vpop.permute.xlu1 %1274 }
 0xf8b   :  { %v1277_v47 = vadd.f32 %v1275_v46, %v1267_v45 }
 0xf8d   :  { %2235 = vtanh.f32 %v1277_v47 }
 0xf8e   :  { %v1178_v49 = vpop.permute.xlu0 %1177 }
 0xf8f   :  { %v1180_v50 = vadd.f32 %v1178_v49, %v1170_v48 }
 0xf91   :  { %2237 = vtanh.f32 %v1180_v50 }
 0xf97   :  { %v2236_v51 = vpop.eup %2235 }
 0xf98   :  { %1280 = vrot.lane.b32.xlu1 %v2236_v51, %s2285_s22 }
 0xf9b   :  { %v2238_v52 = vpop.eup %2237 }
 0xf9c   :  { %1183 = vrot.lane.b32.xlu0 %v2238_v52, %s2285_s22 }
0x100a   :  { %v1281_v53 = vpop.permute.xlu1 %1280 }
0x100b   :  { %v1283_v14 = vmul.f32 %v2232_v39, %v1281_v53 }
0x100d   :  { %1285 = vrot.lane.b32.xlu0 %v1283_v14, %s2286_s23 }
0x100e   :  { %v1184_v54 = vpop.permute.xlu0 %1183 }
0x100f   :  { %v1186_v55 = vmul.f32 %v2234_v42, %v1184_v54 }
0x1011   :  { %1289 = vrot.lane.b32.xlu1 %v1186_v55, %s2281_s16 }
0x107f   :  { %v1286_v57 = vpop.permute.xlu0 %1285 }
0x1080   :  { %2085 = vmatmul.mubr.msk.f32.vlgmr.msra.gmra.mrb[16].mxu0 %vm166_vm6, %v1286_v57 }
0x1081   :  { %2095 = vmatpush3.msk.msra.mxu0 %vm170_vm2, %v2312_v4  ;;  %2096 = vmatprep.mubr.msk.f32.mxu0 %vm2280_vm3, %v2279_v2  ;;  %v154_v4 = vadd.f32 %v2330_v5, %v2442_v19 }
0x1082   :  { %2106 = vmatprep.subr.mxu0 %v2279_v2 }
0x1083   :  { %v1290_v56 = vpop.permute.xlu1 %1289 }
0x1084   :  { %v1292_v58 = vsel %vm166_vm6, %v1286_v57, %v1290_v56 }
0x1085   :  { %2080 = vmatmul.mubr.msk.f32.vlgmr.msra.gmra.mrb[14].mxu1 %vm274_vm7, %v1292_v58 }
0x1086   :  { %2138 = vmatpush3.bf16.msk.msra.mxu1 %vm2338_vm5, %v2350_v26  ;;  %2091 = vmatprep.mubr.msk.f32.mxu1 %vm2280_vm3, %v2279_v2 }
0x1087   :  { %2139 = vmatprep.subr.bf16.mxu1 %v2284_v25 }
0x1153   :  { %v1458_v59 = vpop.f32.mrb[16].mxu0 }
0x1154   :  { %v1462_v60 = vadd.f32 %v1458_v59, %v154_v4  ;;  %v2086_v61 = vpop.f32.mrb[17].mxu0 }
0x1156   :  { %2239 = vtanh.f32 %v1462_v60  ;;  %v1932_v6 = vmul.f32 -1.442695, %v1462_v60 }
0x1158   :  { %v1362_v62 = vpop.f32.mrb[14].mxu1 }
0x1159   :  { %v1363_v63 = vadd.f32 %v2375_v32, %v1362_v62  ;;  %v2081_v0 = vpop.f32.mrb[15].mxu1 }
0x115b   :  { %2241 = vtanh.f32 %v1363_v63  ;;  %v1929_v25 = vmul.f32 -1.442695, %v1363_v63 }
0x115c   :  { %2243 = vpow2.f32 %v1932_v6 }
0x115d   :  { %2245 = vpow2.f32 %v1929_v25 }
0x1160   :  { %v2240_v1 = vpop.eup %2239 }
0x1161   :  { %1472 = vrot.lane.b32.xlu1 %v2240_v1, %s2281_s16 }
0x1165   :  { %v2242_v3 = vpop.eup %2241 }
0x1166   :  { %1375 = vrot.lane.b32.xlu0 %v2242_v3, %s2281_s16  ;;  %v2244_v19 = vpop.eup %2243 }
0x1167   :  { %v1466_v7 = vadd.f32 1.0, %v2244_v19  ;;  %v2246_v8 = vpop.eup %2245 }
0x1168   :  { %v1369_v9 = vadd.f32 1.0, %v2246_v8 }
0x1169   :  { %2247 = vrcp.f32 %v1466_v7 }
0x116a   :  { %2249 = vrcp.f32 %v1369_v9 }
0x1173   :  { %v2248_v10 = vpop.eup %2247 }
0x1174   :  { %v2250_v15 = vpop.eup %2249  ;;  %v1470_v20 = vmul.f32 %v2248_v10, %v1277_v47 }
0x1175   :  { %v1373_v24 = vmul.f32 %v2250_v15, %v1180_v50 }
0x11d3   :  { %v1473_v11 = vpop.permute.xlu1 %1472 }
0x11d4   :  { %v1475_v12 = vmul.f32 %v2248_v10, %v1473_v11 }
0x11d6   :  { %1477 = vrot.lane.b32.xlu1 %v1475_v12, %s2282_s17 }
0x11d8   :  { %v1376_v16 = vpop.permute.xlu0 %1375 }
0x11d9   :  { %v1378_v17 = vmul.f32 %v2250_v15, %v1376_v16 }
0x11db   :  { %1380 = vrot.lane.b32.xlu0 %v1378_v17, %s2282_s17 }
0x1248   :  { %v1478_v21 = vpop.permute.xlu1 %1477 }
0x1249   :  { %v1480_v23 = vadd.f32 %v1478_v21, %v1470_v20 }
0x124b   :  { %2251 = vtanh.f32 %v1480_v23 }
0x124d   :  { %v1381_v27 = vpop.permute.xlu0 %1380 }
0x124e   :  { %v1383_v28 = vadd.f32 %v1381_v27, %v1373_v24 }
0x1250   :  { %2253 = vtanh.f32 %v1383_v28 }
0x1255   :  { %v2252_v29 = vpop.eup %2251 }
0x1256   :  { %1483 = vrot.lane.b32.xlu1 %v2252_v29, %s2285_s22 }
0x125a   :  { %v2254_v30 = vpop.eup %2253 }
0x125b   :  { %1386 = vrot.lane.b32.xlu0 %v2254_v30, %s2285_s22 }
0x12c8   :  { %v1484_v31 = vpop.permute.xlu1 %1483 }
0x12c9   :  { %v1486_v33 = vmul.f32 %v2248_v10, %v1484_v31 }
0x12cb   :  { %1488 = vrot.lane.b32.xlu0 %v1486_v33, %s2286_s23 }
0x12cd   :  { %v1387_v34 = vpop.permute.xlu0 %1386 }
0x12ce   :  { %v1389_v35 = vmul.f32 %v2250_v15, %v1387_v34 }
0x12d0   :  { %1492 = vrot.lane.b32.xlu1 %v1389_v35, %s2281_s16 }
0x133d   :  { %v1489_v13 = vpop.permute.xlu0 %1488 }
0x133e   :  { %2097 = vmatmul.mubr.msk.f32.vlgmr.msra.gmra.mrb[18].mxu0 %vm166_vm6, %v1489_v13 }
0x133f   :  { %2108 = vmatprep.mubr.msk.f32.mxu0 %vm2280_vm3, %v2279_v2 }
0x1342   :  { %v1493_v36 = vpop.permute.xlu1 %1492 }
0x1343   :  { %v1495_v37 = vsel %vm166_vm6, %v1489_v13, %v1493_v36 }
0x1344   :  { %2092 = vmatmul.mubr.msk.f32.vlgmr.msra.gmra.mrb[16].mxu1 %vm274_vm7, %v1495_v37 }
0x1345   :  { %2142 = vmatpush3.bf16.msk.msra.mxu1 %vm2338_vm5, %v2350_v26  ;;  %2103 = vmatprep.mubr.msk.f32.mxu1 %vm2280_vm3, %v2279_v2 }
0x1411   :  { %v1661_v39 = vpop.f32.mrb[18].mxu0 }
0x1412   :  { %v1665_v40 = vadd.f32 %v1661_v39, %v159_v38  ;;  %v2098_v41 = vpop.f32.mrb[19].mxu0 }
0x1414   :  { %2255 = vtanh.f32 %v1665_v40  ;;  %v1938_v26 = vmul.f32 -1.442695, %v1665_v40 }
0x1417   :  { %v1565_v42 = vpop.f32.mrb[16].mxu1 }
0x1418   :  { %v1566_v43 = vadd.f32 %v2375_v32, %v1565_v42  ;;  %v2093_v44 = vpop.f32.mrb[17].mxu1 }
0x141a   :  { %2257 = vtanh.f32 %v1566_v43  ;;  %v1935_v2 = vmul.f32 -1.442695, %v1566_v43 }
0x141b   :  { %2259 = vpow2.f32 %v1938_v26 }
0x141c   :  { %2261 = vpow2.f32 %v1935_v2 }
0x141e   :  { %v2256_v45 = vpop.eup %2255 }
0x141f   :  { %1675 = vrot.lane.b32.xlu1 %v2256_v45, %s2281_s16 }
0x1424   :  { %v2258_v22 = vpop.eup %2257 }
0x1425   :  { %1578 = vrot.lane.b32.xlu0 %v2258_v22, %s2281_s16  ;;  %v2260_v5 = vpop.eup %2259 }
0x1426   :  { %v1669_v18 = vadd.f32 1.0, %v2260_v5  ;;  %v2262_v46 = vpop.eup %2261 }
0x1427   :  { %v1572_v47 = vadd.f32 1.0, %v2262_v46 }
0x1428   :  { %2263 = vrcp.f32 %v1669_v18 }
0x1429   :  { %2265 = vrcp.f32 %v1572_v47 }
0x1432   :  { %v2264_v48 = vpop.eup %2263 }
0x1433   :  { %v2266_v51 = vpop.eup %2265  ;;  %v1673_v14 = vmul.f32 %v2264_v48, %v1480_v23 }
0x1434   :  { %v1576_v57 = vmul.f32 %v2266_v51, %v1383_v28  ;;  %v1942_v28 = vld [vmem:[%s2595_s0 + $0x70] ss:$0 sm:$0xff] }
0x1491   :  { %v1676_v49 = vpop.permute.xlu1 %1675 }
0x1492   :  { %v1678_v50 = vmul.f32 %v2264_v48, %v1676_v49 }
0x1494   :  { %1680 = vrot.lane.b32.xlu1 %v1678_v50, %s2282_s17 }
0x1497   :  { %v1579_v52 = vpop.permute.xlu0 %1578 }
0x1498   :  { %v1581_v53 = vmul.f32 %v2266_v51, %v1579_v52 }
0x149a   :  { %1583 = vrot.lane.b32.xlu0 %v1581_v53, %s2282_s17 }
0x1506   :  { %v1681_v54 = vpop.permute.xlu1 %1680 }
0x1507   :  { %v1683_v55 = vadd.f32 %v1681_v54, %v1673_v14 }
0x1509   :  { %2267 = vtanh.f32 %v1683_v55 }
0x150c   :  { %v1584_v56 = vpop.permute.xlu0 %1583 }
0x150d   :  { %v1586_v58 = vadd.f32 %v1584_v56, %v1576_v57 }
0x150f   :  { %2269 = vtanh.f32 %v1586_v58 }
0x1513   :  { %v2268_v4 = vpop.eup %2267 }
0x1514   :  { %1686 = vrot.lane.b32.xlu1 %v2268_v4, %s2285_s22 }
0x1519   :  { %v2270_v59 = vpop.eup %2269 }
0x151a   :  { %1589 = vrot.lane.b32.xlu0 %v2270_v59, %s2285_s22 }
0x1586   :  { %v1687_v60 = vpop.permute.xlu1 %1686 }
0x1587   :  { %v1689_v61 = vmul.f32 %v2264_v48, %v1687_v60 }
0x1589   :  { %1691 = vrot.lane.b32.xlu0 %v1689_v61, %s2286_s23 }
0x158c   :  { %v1590_v62 = vpop.permute.xlu0 %1589 }
0x158d   :  { %v1592_v63 = vmul.f32 %v2266_v51, %v1590_v62 }
0x158f   :  { %1695 = vrot.lane.b32.xlu1 %v1592_v63, %s2281_s16 }
0x15fb   :  { %v1692_v0 = vpop.permute.xlu0 %1691 }
0x1601   :  { %v1696_v1 = vpop.permute.xlu1 %1695 }
0x1602   :  { %v1698_v3 = vsel %vm166_vm6, %v1692_v0, %v1696_v1 }
0x1603   :  { %2104 = vmatmul.mubr.msk.f32.vlgmr.msra.gmra.mrb[18].mxu1 %vm274_vm7, %v1698_v3 }
0x16d6   :  { %v1768_v6 = vpop.f32.mrb[18].mxu1 }
0x16d7   :  { %v1769_v25 = vadd.f32 %v2375_v32, %v1768_v6  ;;  %v2105_v19 = vpop.f32.mrb[19].mxu1  ;;  %v22_v32 = vld [vmem:[%s2595_s0 + $0x68] sm:$0x3f] }
0x16d8   :  { %2107 = vmatpush3.msk.msra.mxu0 %vm170_vm2, %v22_v32 }
0x16d9   :  { %2271 = vtanh.f32 %v1769_v25  ;;  %v1941_v8 = vmul.f32 -1.442695, %v1769_v25 }
0x16db   :  { %2273 = vpow2.f32 %v1941_v8 }
0x16e3   :  { %v2272_v7 = vpop.eup %2271 }
0x16e4   :  { %1781 = vrot.lane.b32.xlu0 %v2272_v7, %s2281_s16 }
0x16e5   :  { %v2274_v9 = vpop.eup %2273 }
0x16e6   :  { %v1775_v10 = vadd.f32 1.0, %v2274_v9 }
0x16e8   :  { %2275 = vrcp.f32 %v1775_v10 }
0x16f2   :  { %v2276_v11 = vpop.eup %2275 }
0x16f3   :  { %v1779_v16 = vmul.f32 %v2276_v11, %v1586_v58 }
0x1756   :  { %v1782_v12 = vpop.permute.xlu0 %1781 }
0x1757   :  { %v1784_v15 = vmul.f32 %v2276_v11, %v1782_v12 }
0x1759   :  { %1786 = vrot.lane.b32.xlu1 %v1784_v15, %s2282_s17 }
0x17cb   :  { %v1787_v17 = vpop.permute.xlu1 %1786 }
0x17cc   :  { %v1789_v20 = vadd.f32 %v1787_v17, %v1779_v16 }
0x17ce   :  { %2277 = vtanh.f32 %v1789_v20 }
0x17d8   :  { %v2278_v21 = vpop.eup %2277 }
0x17d9   :  { %1792 = vrot.lane.b32.xlu0 %v2278_v21, %s2285_s22 }
0x184b   :  { %v1793_v23 = vpop.permute.xlu0 %1792 }
0x184c   :  { %v1795_v24 = vmul.f32 %v2276_v11, %v1793_v23 }
0x184e   :  { %1801 = vrot.lane.b32.xlu1 %v1795_v24, %s2286_s23 }
0x18c0   :  { %v1802_v27 = vpop.permute.xlu1 %1801 }
0x18c1   :  { %2109 = vmatmul.mubr.msk.f32.vlgmr.msra.gmra.mrb[20].mxu0 %vm166_vm6, %v1802_v27 }
0x1994   :  { %v1874_v29 = vpop.f32.mrb[20].mxu0 }
0x1995   :  { %v1875_v30 = vadd.f32 %v1942_v28, %v1874_v29  ;;  %v2110_v31 = vpop.f32.mrb[21].mxu0 }
0x1997   :  { %1879 = vst.msk [vmem:[%s2596_s1] sm:$0xff] %vm1878_vm8, %v1875_v30 }

</bundles_post_ra>
